<compile_context>
chip_gen: v7x
topology: tpu7x:2x2x1
jax: 0.10.0
libtpu: 0.0.40
codegen_flags: <defaults>
</compile_context>

<pallas_src>
import functools

import jax
import jax.numpy as jnp
from jax.experimental import pallas as pl
from jax.experimental.pallas import tpu as pltpu


def _round_up(x, m):
    return (x + m - 1) // m * m


# --------------------------------------------------------------------------
# Pallas kernel: `batch_block` batch elements per grid step.
# --------------------------------------------------------------------------
def _gcn_lstm_kernel(x_ref, h_ref, c_ref, a_ref, wx_ref, wh_ref, bg_ref,
                     wci_ref, wcf_ref, wco_ref, h_out_ref, c_out_ref, g_ref,
                     *, cin, cout, batch_block, activation):
    act = jnp.tanh if activation == "tanh" else jax.nn.relu

    # ---- graph aggregation, batched on the sublane/M axis ------------------
    # agg = nodes^T @ A_hat^T for ALL batch elements of this step at once:
    # (Bb*C, N) @ (N, N).  bf16 MXU operands, f32 accumulation.
    a_bf = a_ref[...]                                          # (Np, Np) bf16
    agg_x = jnp.dot(x_ref[...].astype(jnp.bfloat16), a_bf,
                    preferred_element_type=jnp.float32)        # (Bb*Cin,  Np)
    agg_h = jnp.dot(h_ref[...].astype(jnp.bfloat16), a_bf,
                    preferred_element_type=jnp.float32)        # (Bb*Cout, Np)

    wx = wx_ref[...]                                           # (4*Cout, Cin)  bf16
    wh = wh_ref[...]                                           # (4*Cout, Cout) bf16
    bg = bg_ref[...]                                           # (4*Cout, Np)   f32
    wci = wci_ref[...]
    wcf = wcf_ref[...]
    wco = wco_ref[...]

    # ---- per batch element: project + gate (statically unrolled, Bb small) -
    for b in range(batch_block):
        ax = agg_x[b * cin:(b + 1) * cin, :].astype(jnp.bfloat16)
        ah = agg_h[b * cout:(b + 1) * cout, :].astype(jnp.bfloat16)

        # Aggregate-then-project: G^T = W_x^T agg_x + W_h^T agg_h + b.
        # Staged through VMEM scratch so 4*Cout*Np f32 never sits in vregs.
        g_ref[...] = (jnp.dot(wx, ax, preferred_element_type=jnp.float32)
                      + jnp.dot(wh, ah, preferred_element_type=jnp.float32)
                      + bg)

        c_prev = c_ref[b * cout:(b + 1) * cout, :]             # (Cout, Np) f32
        i_g = g_ref[0 * cout:1 * cout, :]
        f_g = g_ref[1 * cout:2 * cout, :]
        c_g = g_ref[2 * cout:3 * cout, :]
        o_g = g_ref[3 * cout:4 * cout, :]

        input_gate = jax.nn.sigmoid(i_g + wci * c_prev)
        forget_gate = jax.nn.sigmoid(f_g + wcf * c_prev)
        c_new = forget_gate * c_prev + input_gate * act(c_g)
        output_gate = jax.nn.sigmoid(o_g + wco * c_new)
        h_new = output_gate * act(c_new)

        h_out_ref[b * cout:(b + 1) * cout, :] = h_new.astype(h_out_ref.dtype)
        c_out_ref[b * cout:(b + 1) * cout, :] = c_new.astype(c_out_ref.dtype)


# --------------------------------------------------------------------------
# One-time weight prep (hoisted out of the per-step call / scan body).
# --------------------------------------------------------------------------
def prepare_params(params):
    W_gcn, b_gcn, A_hat = params["W_gcn"], params["b_gcn"], params["A_hat"]
    W_ci, W_cf, W_co = params["W_ci"], params["W_cf"], params["W_co"]

    cout = W_ci.shape[0]
    cin = W_gcn.shape[0] - cout
    n = A_hat.shape[0]
    n_pad = _round_up(n, 128)

    # Transpose applied ONCE here (for the symmetric-normalized grid adjacency
    # A_hat^T == A_hat, but keep .T so asymmetric adjacencies stay correct).
    a_t = A_hat.T
    if n_pad != n:
        a_t = jnp.pad(a_t, ((0, n_pad - n), (0, n_pad - n)))
    a_t = a_t.astype(jnp.bfloat16)
    # NOTE: keep A_hat in f32 on v5e if long scanned rollouts drift numerically.

    def _nodes(w):  # (Cout, H, W) -> (Cout, n_pad) node layout, lane-padded
        w = w.reshape(cout, n)
        if n_pad != n:
            w = jnp.pad(w, ((0, 0), (0, n_pad - n)))
        return w.astype(jnp.float32)

    return {
        "a_t": a_t,                                            # (Np, Np)      bf16
        "wx_t": W_gcn[:cin].T.astype(jnp.bfloat16),            # (4*Cout, Cin)  bf16
        "wh_t": W_gcn[cin:].T.astype(jnp.bfloat16),            # (4*Cout, Cout) bf16
        "bias": jnp.broadcast_to(b_gcn[:, None].astype(jnp.float32),
                                 (4 * cout, n_pad)),           # pre-broadcast bias
        "wci": _nodes(W_ci),
        "wcf": _nodes(W_cf),
        "wco": _nodes(W_co),
    }


# --------------------------------------------------------------------------
# Per-step wrapper: reshape-only NCHW <-> (B*C, N) plumbing + pallas_call.
# --------------------------------------------------------------------------
def gcn_lstm_cell(X, H_prev, C_prev, prep, activation="tanh", batch_block=None):
    """X: (B, Cin, H, W); H_prev/C_prev: (B, Cout, H, W) — NCHW like torch."""
    B, Cin, Hh, Ww = X.shape
    Cout = H_prev.shape[1]
    N = Hh * Ww
    Np = prep["a_t"].shape[0]
    assert prep["wx_t"].shape[1] == Cin and prep["wh_t"].shape[1] == Cout

    if batch_block is None:
        # Collapse the batch grid: weights/A_hat DMA'd once, no per-step
        # pipeline overhead (best for v5e/v6e).  On v7x pass batch_block=B//2
        # so each TensorCore takes one batch block.
        batch_block = B
    assert B % batch_block == 0
    if batch_block != B:
        # Keep the flattened (Bb*C, N) blocks sublane-aligned.
        assert (batch_block * Cin) % 8 == 0 and (batch_block * Cout) % 8 == 0

    # Pure reshapes (no transposes, no concat): NCHW -> (B*C, N) node layout.
    x2 = X.reshape(B * Cin, N)
    h2 = H_prev.reshape(B * Cout, N)
    c2 = C_prev.reshape(B * Cout, N)
    if Np != N:  # lane-pad node axis -> unmasked vst stores, aligned MXU tiles
        pad = ((0, 0), (0, Np - N))
        x2, h2, c2 = jnp.pad(x2, pad), jnp.pad(h2, pad), jnp.pad(c2, pad)

    kernel = functools.partial(_gcn_lstm_kernel, cin=Cin, cout=Cout,
                               batch_block=batch_block, activation=activation)

    batched = lambda i: (i, 0)
    fixed = lambda i: (0, 0)
    grid = (B // batch_block,)

    # Conservative VMEM budget: 2x (double buffering) on every block + scratch.
    blk_bytes = ((batch_block * Cin * Np + 2 * batch_block * Cout * Np) * 4
                 + Np * Np * 2
                 + (4 * Cout * Cin + 4 * Cout * Cout) * 2
                 + 4 * Cout * Np * 4
                 + 3 * Cout * Np * 4
                 + 2 * batch_block * Cout * Np * 4)
    scratch_bytes = 4 * Cout * Np * 4
    vmem_limit = int(min(max(2 * blk_bytes + scratch_bytes + (4 << 20),
                             32 << 20), 96 << 20))
    # NOTE(v7x, large frames): A_hat^T (Np^2 bf16) dominates VMEM.  Beyond
    # Np ~ 3-4k, tile it over an extra "arbitrary" node/contraction grid axis
    # with a VMEM accumulator, or replace the dense adjacency dot with the
    # 5-point stencil it encodes (pltpu.roll shifts + D^{-1/2} scales).

    h_out, c_out = pl.pallas_call(
        kernel,
        out_shape=(jax.ShapeDtypeStruct((B * Cout, Np), jnp.float32),
                   jax.ShapeDtypeStruct((B * Cout, Np), jnp.float32)),
        grid_spec=pltpu.PrefetchScalarGridSpec(
            num_scalar_prefetch=0,
            grid=grid,
            in_specs=[
                pl.BlockSpec((batch_block * Cin, Np), batched),   # X nodes
                pl.BlockSpec((batch_block * Cout, Np), batched),  # H_prev nodes
                pl.BlockSpec((batch_block * Cout, Np), batched),  # C_prev nodes
                pl.BlockSpec((Np, Np), fixed),                    # A_hat^T (bf16)
                pl.BlockSpec((4 * Cout, Cin), fixed),             # W_x^T (bf16)
                pl.BlockSpec((4 * Cout, Cout), fixed),            # W_h^T (bf16)
                pl.BlockSpec((4 * Cout, Np), fixed),              # bias (pre-broadcast)
                pl.BlockSpec((Cout, Np), fixed),                  # W_ci
                pl.BlockSpec((Cout, Np), fixed),                  # W_cf
                pl.BlockSpec((Cout, Np), fixed),                  # W_co
            ],
            out_specs=[
                pl.BlockSpec((batch_block * Cout, Np), batched),  # H_new (lane-dense)
                pl.BlockSpec((batch_block * Cout, Np), batched),  # C_new (lane-dense)
            ],
            scratch_shapes=[pltpu.VMEM((4 * Cout, Np), jnp.float32)],
        ),
        compiler_params=pltpu.CompilerParams(
            dimension_semantics=("parallel",),
            vmem_limit_bytes=vmem_limit),
    )(x2, h2, c2, prep["a_t"], prep["wx_t"], prep["wh_t"], prep["bias"],
      prep["wci"], prep["wcf"], prep["wco"])

    if Np != N:
        h_out, c_out = h_out[:, :N], c_out[:, :N]
    # (B*Cout, N) -> NCHW is a pure reshape.
    return h_out.reshape(B, Cout, Hh, Ww), c_out.reshape(B, Cout, Hh, Ww)


# --------------------------------------------------------------------------
# Deterministic parameter / adjacency construction (no checkpoint load)
# --------------------------------------------------------------------------
def grid_adjacency(h, w):
    """Symmetric-normalized 4-neighbor grid adjacency with self loops."""
    n = h * w
    idx = jnp.arange(n)
    r, c = idx // w, idx % w
    A = jnp.eye(n, dtype=jnp.float32)
    cols = jnp.arange(n)[None, :]
    for dr, dc in [(-1, 0), (1, 0), (0, -1), (0, 1)]:
        r2, c2 = r + dr, c + dc
        valid = (r2 >= 0) & (r2 < h) & (c2 >= 0) & (c2 < w)
        j = jnp.clip(r2 * w + c2, 0, n - 1)
        A = A + jnp.where(valid[:, None] & (cols == j[:, None]), 1.0, 0.0)
    dinv = 1.0 / jnp.sqrt(A.sum(axis=1))
    return A * dinv[:, None] * dinv[None, :]


def init_params(key, in_channels, out_channels, frame_size):
    Hh, Ww = frame_size
    k = jax.random.split(key, 5)
    cin_tot = in_channels + out_channels
    return {
        "W_gcn": jax.random.uniform(k[0], (cin_tot, 4 * out_channels),
                                    jnp.float32, -0.1, 0.1),
        "b_gcn": jax.random.uniform(k[1], (4 * out_channels,),
                                    jnp.float32, -0.1, 0.1),
        "A_hat": grid_adjacency(Hh, Ww),
        "W_ci": jax.random.uniform(k[2], (out_channels, Hh, Ww), jnp.float32),
        "W_cf": jax.random.uniform(k[3], (out_channels, Hh, Ww), jnp.float32),
        "W_co": jax.random.uniform(k[4], (out_channels, Hh, Ww), jnp.float32),
    }


# --------------------------------------------------------------------------
# Pure-JAX reference (f32, NCHW, mirrors the torch forward) for verification
# --------------------------------------------------------------------------
def reference(X, H_prev, C_prev, p, activation="tanh"):
    act = jnp.tanh if activation == "tanh" else jax.nn.relu
    B, Cin, Hh, Ww = X.shape
    Cout = H_prev.shape[1]
    N = Hh * Ww
    xh = jnp.concatenate([X, H_prev], axis=1)                    # (B, Cin+Cout, H, W)
    nodes = xh.transpose(0, 2, 3, 1).reshape(B, N, Cin + Cout)   # (B, N, C)
    g = jnp.einsum("nm,bmc->bnc", p["A_hat"], nodes @ p["W_gcn"]) + p["b_gcn"]
    g = g.reshape(B, Hh, Ww, 4 * Cout).transpose(0, 3, 1, 2)     # (B, 4*Cout, H, W)
    i_g, f_g, c_g, o_g = jnp.split(g, 4, axis=1)
    input_gate = jax.nn.sigmoid(i_g + p["W_ci"] * C_prev)
    forget_gate = jax.nn.sigmoid(f_g + p["W_cf"] * C_prev)
    C = forget_gate * C_prev + input_gate * act(c_g)
    output_gate = jax.nn.sigmoid(o_g + p["W_co"] * C)
    H = output_gate * act(C)
    return H, C


if __name__ == "__main__":
    B, Cin, Cout = 2, 4, 32
    frame_size = (8, 16)            # N = H*W = 128 graph nodes -> one lane width
    Hh, Ww = frame_size

    key = jax.random.PRNGKey(0)
    kx, kh, kc, kp = jax.random.split(key, 4)
    X = jax.random.normal(kx, (B, Cin, Hh, Ww), jnp.float32)
    H_prev = jax.random.normal(kh, (B, Cout, Hh, Ww), jnp.float32)
    C_prev = jax.random.normal(kc, (B, Cout, Hh, Ww), jnp.float32)
    params = init_params(kp, Cin, Cout, frame_size)

    # Hoisted one-time weight prep (would sit outside a time-step scan).
    prep = prepare_params(params)

    fwd = jax.jit(functools.partial(gcn_lstm_cell, activation="tanh"))
    H_out, C_out = fwd(X, H_prev, C_prev, prep)
    jax.block_until_ready((H_out, C_out))

    # Tolerance accounts for bf16 MXU operands in the kernel vs the pure-f32
    # reference; gate math and accumulation stay in f32.
    H_ref, C_ref = reference(X, H_prev, C_prev, params, activation="tanh")
    assert jnp.allclose(H_out, H_ref, atol=3e-2, rtol=3e-2), \
        float(jnp.max(jnp.abs(H_out - H_ref)))
    assert jnp.allclose(C_out, C_ref, atol=3e-2, rtol=3e-2), \
        float(jnp.max(jnp.abs(C_out - C_ref)))

    print("KERNEL_OK")
</pallas_src>

<mosaic_0001>
module attributes {stable_mosaic.version = 11 : i64} {
  func.func @_gcn_lstm_kernel(%arg0: i32, %arg1: memref<8x128xf32, #tpu.memory_space<vmem>>, %arg2: memref<64x128xf32, #tpu.memory_space<vmem>>, %arg3: memref<64x128xf32, #tpu.memory_space<vmem>>, %arg4: memref<128x128xbf16, #tpu.memory_space<vmem>>, %arg5: memref<128x4xbf16, #tpu.memory_space<vmem>>, %arg6: memref<128x32xbf16, #tpu.memory_space<vmem>>, %arg7: memref<128x128xf32, #tpu.memory_space<vmem>>, %arg8: memref<32x128xf32, #tpu.memory_space<vmem>>, %arg9: memref<32x128xf32, #tpu.memory_space<vmem>>, %arg10: memref<32x128xf32, #tpu.memory_space<vmem>>, %arg11: memref<64x128xf32, #tpu.memory_space<vmem>>, %arg12: memref<64x128xf32, #tpu.memory_space<vmem>>, %arg13: memref<128x128xf32, #tpu.memory_space<vmem>>) attributes {dimension_semantics = [#tpu.dimension_semantics<parallel>], iteration_bounds = array<i64: 1>, scalar_prefetch = 0 : i64, scratch_operands = 1 : i64, tpu.core_type = #tpu.core_type<tc>, window_params = [{transform_indices = @transform_0, window_bounds = array<i64: 8, 128>}, {transform_indices = @transform_1, window_bounds = array<i64: 64, 128>}, {transform_indices = @transform_2, window_bounds = array<i64: 64, 128>}, {pipeline_mode = #tpu.pipeline_mode<synchronous>, transform_indices = @transform_3, window_bounds = array<i64: 128, 128>}, {pipeline_mode = #tpu.pipeline_mode<synchronous>, transform_indices = @transform_4, window_bounds = array<i64: 128, 4>}, {pipeline_mode = #tpu.pipeline_mode<synchronous>, transform_indices = @transform_5, window_bounds = array<i64: 128, 32>}, {pipeline_mode = #tpu.pipeline_mode<synchronous>, transform_indices = @transform_6, window_bounds = array<i64: 128, 128>}, {pipeline_mode = #tpu.pipeline_mode<synchronous>, transform_indices = @transform_7, window_bounds = array<i64: 32, 128>}, {pipeline_mode = #tpu.pipeline_mode<synchronous>, transform_indices = @transform_8, window_bounds = array<i64: 32, 128>}, {pipeline_mode = #tpu.pipeline_mode<synchronous>, transform_indices = @transform_9, window_bounds = array<i64: 32, 128>}, {transform_indices = @transform_10, window_bounds = array<i64: 64, 128>}, {transform_indices = @transform_11, window_bounds = array<i64: 64, 128>}]} {
    %c0 = arith.constant 0 : index
    %c0_0 = arith.constant 0 : index
    %0 = vector.load %arg4[%c0, %c0_0] : memref<128x128xbf16, #tpu.memory_space<vmem>>, vector<128x128xbf16>
    %c0_1 = arith.constant 0 : index
    %c0_2 = arith.constant 0 : index
    %1 = vector.load %arg1[%c0_1, %c0_2] : memref<8x128xf32, #tpu.memory_space<vmem>>, vector<8x128xf32>
    %2 = arith.truncf %1 : vector<8x128xf32> to vector<8x128xbf16>
    %cst = arith.constant dense<0.000000e+00> : vector<8x128xf32>
    %3 = tpu.matmul %2, %0, %cst {dimension_numbers = #tpu.dot_dimension_numbers<[1], [0], [0], [1], [0, 0, 1, 1], [], []>} : vector<8x128xbf16>, vector<128x128xbf16>, vector<8x128xf32> -> vector<8x128xf32>
    %c0_3 = arith.constant 0 : index
    %c0_4 = arith.constant 0 : index
    %4 = vector.load %arg2[%c0_3, %c0_4] : memref<64x128xf32, #tpu.memory_space<vmem>>, vector<64x128xf32>
    %5 = arith.truncf %4 : vector<64x128xf32> to vector<64x128xbf16>
    %cst_5 = arith.constant dense<0.000000e+00> : vector<64x128xf32>
    %6 = tpu.matmul %5, %0, %cst_5 {dimension_numbers = #tpu.dot_dimension_numbers<[1], [0], [0], [1], [0, 0, 1, 1], [], []>} : vector<64x128xbf16>, vector<128x128xbf16>, vector<64x128xf32> -> vector<64x128xf32>
    %c0_6 = arith.constant 0 : index
    %c0_7 = arith.constant 0 : index
    %7 = vector.load %arg5[%c0_6, %c0_7] : memref<128x4xbf16, #tpu.memory_space<vmem>>, vector<128x4xbf16>
    %c0_8 = arith.constant 0 : index
    %c0_9 = arith.constant 0 : index
    %8 = vector.load %arg6[%c0_8, %c0_9] : memref<128x32xbf16, #tpu.memory_space<vmem>>, vector<128x32xbf16>
    %c0_10 = arith.constant 0 : index
    %c0_11 = arith.constant 0 : index
    %9 = vector.load %arg7[%c0_10, %c0_11] : memref<128x128xf32, #tpu.memory_space<vmem>>, vector<128x128xf32>
    %c0_12 = arith.constant 0 : index
    %c0_13 = arith.constant 0 : index
    %10 = vector.load %arg8[%c0_12, %c0_13] : memref<32x128xf32, #tpu.memory_space<vmem>>, vector<32x128xf32>
    %c0_14 = arith.constant 0 : index
    %c0_15 = arith.constant 0 : index
    %11 = vector.load %arg9[%c0_14, %c0_15] : memref<32x128xf32, #tpu.memory_space<vmem>>, vector<32x128xf32>
    %c0_16 = arith.constant 0 : index
    %c0_17 = arith.constant 0 : index
    %12 = vector.load %arg10[%c0_16, %c0_17] : memref<32x128xf32, #tpu.memory_space<vmem>>, vector<32x128xf32>
    %13 = vector.extract_strided_slice %3 {offsets = [0, 0], sizes = [4, 128], strides = [1, 1]} : vector<8x128xf32> to vector<4x128xf32>
    %14 = arith.truncf %13 : vector<4x128xf32> to vector<4x128xbf16>
    %15 = vector.extract_strided_slice %6 {offsets = [0, 0], sizes = [32, 128], strides = [1, 1]} : vector<64x128xf32> to vector<32x128xf32>
    %16 = arith.truncf %15 : vector<32x128xf32> to vector<32x128xbf16>
    %cst_18 = arith.constant dense<0.000000e+00> : vector<128x128xf32>
    %17 = tpu.matmul %7, %14, %cst_18 {dimension_numbers = #tpu.dot_dimension_numbers<[1], [0], [0], [1], [0, 0, 1, 1], [], []>} : vector<128x4xbf16>, vector<4x128xbf16>, vector<128x128xf32> -> vector<128x128xf32>
    %cst_19 = arith.constant dense<0.000000e+00> : vector<128x128xf32>
    %18 = tpu.matmul %8, %16, %cst_19 {dimension_numbers = #tpu.dot_dimension_numbers<[1], [0], [0], [1], [0, 0, 1, 1], [], []>} : vector<128x32xbf16>, vector<32x128xbf16>, vector<128x128xf32> -> vector<128x128xf32>
    %19 = arith.addf %17, %18 : vector<128x128xf32>
    %20 = arith.addf %19, %9 : vector<128x128xf32>
    %c0_20 = arith.constant 0 : index
    %c0_21 = arith.constant 0 : index
    %21 = vector.load %arg13[%c0_20, %c0_21] : memref<128x128xf32, #tpu.memory_space<vmem>>, vector<128x128xf32>
    tpu.vector_store %arg13[%c0_20, %c0_21], %20 {strides = array<i32>} : memref<128x128xf32, #tpu.memory_space<vmem>>, vector<128x128xf32>,
    %c0_22 = arith.constant 0 : index
    %c0_23 = arith.constant 0 : index
    %22 = vector.load %arg3[%c0_22, %c0_23] : memref<64x128xf32, #tpu.memory_space<vmem>>, vector<32x128xf32>
    %c0_24 = arith.constant 0 : index
    %c0_25 = arith.constant 0 : index
    %23 = vector.load %arg13[%c0_24, %c0_25] : memref<128x128xf32, #tpu.memory_space<vmem>>, vector<32x128xf32>
    %c32 = arith.constant 32 : index
    %c0_26 = arith.constant 0 : index
    %24 = vector.load %arg13[%c32, %c0_26] : memref<128x128xf32, #tpu.memory_space<vmem>>, vector<32x128xf32>
    %c64 = arith.constant 64 : index
    %c0_27 = arith.constant 0 : index
    %25 = vector.load %arg13[%c64, %c0_27] : memref<128x128xf32, #tpu.memory_space<vmem>>, vector<32x128xf32>
    %c96 = arith.constant 96 : index
    %c0_28 = arith.constant 0 : index
    %26 = vector.load %arg13[%c96, %c0_28] : memref<128x128xf32, #tpu.memory_space<vmem>>, vector<32x128xf32>
    %27 = arith.mulf %10, %22 : vector<32x128xf32>
    %28 = arith.addf %23, %27 : vector<32x128xf32>
    %29 = arith.negf %28 : vector<32x128xf32>
    %30 = math.exp %29 : vector<32x128xf32>
    %cst_29 = arith.constant 1.000000e+00 : f32
    %31 = vector.broadcast %cst_29 : f32 to vector<32x128xf32>
    %32 = arith.addf %31, %30 : vector<32x128xf32>
    %33 = arith.divf %31, %32 : vector<32x128xf32>
    %34 = arith.mulf %11, %22 : vector<32x128xf32>
    %35 = arith.addf %24, %34 : vector<32x128xf32>
    %36 = arith.negf %35 : vector<32x128xf32>
    %37 = math.exp %36 : vector<32x128xf32>
    %cst_30 = arith.constant 1.000000e+00 : f32
    %38 = vector.broadcast %cst_30 : f32 to vector<32x128xf32>
    %39 = arith.addf %38, %37 : vector<32x128xf32>
    %40 = arith.divf %38, %39 : vector<32x128xf32>
    %41 = arith.mulf %40, %22 : vector<32x128xf32>
    %42 = math.tanh %25 : vector<32x128xf32>
    %43 = arith.mulf %33, %42 : vector<32x128xf32>
    %44 = arith.addf %41, %43 : vector<32x128xf32>
    %45 = arith.mulf %12, %44 : vector<32x128xf32>
    %46 = arith.addf %26, %45 : vector<32x128xf32>
    %47 = arith.negf %46 : vector<32x128xf32>
    %48 = math.exp %47 : vector<32x128xf32>
    %cst_31 = arith.constant 1.000000e+00 : f32
    %49 = vector.broadcast %cst_31 : f32 to vector<32x128xf32>
    %50 = arith.addf %49, %48 : vector<32x128xf32>
    %51 = arith.divf %49, %50 : vector<32x128xf32>
    %52 = math.tanh %44 : vector<32x128xf32>
    %53 = arith.mulf %51, %52 : vector<32x128xf32>
    %c0_32 = arith.constant 0 : index
    %c0_33 = arith.constant 0 : index
    %54 = vector.load %arg11[%c0_32, %c0_33] : memref<64x128xf32, #tpu.memory_space<vmem>>, vector<32x128xf32>
    tpu.vector_store %arg11[%c0_32, %c0_33], %53 {strides = array<i32>} : memref<64x128xf32, #tpu.memory_space<vmem>>, vector<32x128xf32>,
    %c0_34 = arith.constant 0 : index
    %c0_35 = arith.constant 0 : index
    %55 = vector.load %arg12[%c0_34, %c0_35] : memref<64x128xf32, #tpu.memory_space<vmem>>, vector<32x128xf32>
    tpu.vector_store %arg12[%c0_34, %c0_35], %44 {strides = array<i32>} : memref<64x128xf32, #tpu.memory_space<vmem>>, vector<32x128xf32>,
    %56 = vector.extract_strided_slice %3 {offsets = [4, 0], sizes = [4, 128], strides = [1, 1]} : vector<8x128xf32> to vector<4x128xf32>
    %57 = arith.truncf %56 : vector<4x128xf32> to vector<4x128xbf16>
    %58 = vector.extract_strided_slice %6 {offsets = [32, 0], sizes = [32, 128], strides = [1, 1]} : vector<64x128xf32> to vector<32x128xf32>
    %59 = arith.truncf %58 : vector<32x128xf32> to vector<32x128xbf16>
    %cst_36 = arith.constant dense<0.000000e+00> : vector<128x128xf32>
    %60 = tpu.matmul %7, %57, %cst_36 {dimension_numbers = #tpu.dot_dimension_numbers<[1], [0], [0], [1], [0, 0, 1, 1], [], []>} : vector<128x4xbf16>, vector<4x128xbf16>, vector<128x128xf32> -> vector<128x128xf32>
    %cst_37 = arith.constant dense<0.000000e+00> : vector<128x128xf32>
    %61 = tpu.matmul %8, %59, %cst_37 {dimension_numbers = #tpu.dot_dimension_numbers<[1], [0], [0], [1], [0, 0, 1, 1], [], []>} : vector<128x32xbf16>, vector<32x128xbf16>, vector<128x128xf32> -> vector<128x128xf32>
    %62 = arith.addf %60, %61 : vector<128x128xf32>
    %63 = arith.addf %62, %9 : vector<128x128xf32>
    %c0_38 = arith.constant 0 : index
    %c0_39 = arith.constant 0 : index
    %64 = vector.load %arg13[%c0_38, %c0_39] : memref<128x128xf32, #tpu.memory_space<vmem>>, vector<128x128xf32>
    tpu.vector_store %arg13[%c0_38, %c0_39], %63 {strides = array<i32>} : memref<128x128xf32, #tpu.memory_space<vmem>>, vector<128x128xf32>,
    %c32_40 = arith.constant 32 : index
    %c0_41 = arith.constant 0 : index
    %65 = vector.load %arg3[%c32_40, %c0_41] : memref<64x128xf32, #tpu.memory_space<vmem>>, vector<32x128xf32>
    %c0_42 = arith.constant 0 : index
    %c0_43 = arith.constant 0 : index
    %66 = vector.load %arg13[%c0_42, %c0_43] : memref<128x128xf32, #tpu.memory_space<vmem>>, vector<32x128xf32>
    %c32_44 = arith.constant 32 : index
    %c0_45 = arith.constant 0 : index
    %67 = vector.load %arg13[%c32_44, %c0_45] : memref<128x128xf32, #tpu.memory_space<vmem>>, vector<32x128xf32>
    %c64_46 = arith.constant 64 : index
    %c0_47 = arith.constant 0 : index
    %68 = vector.load %arg13[%c64_46, %c0_47] : memref<128x128xf32, #tpu.memory_space<vmem>>, vector<32x128xf32>
    %c96_48 = arith.constant 96 : index
    %c0_49 = arith.constant 0 : index
    %69 = vector.load %arg13[%c96_48, %c0_49] : memref<128x128xf32, #tpu.memory_space<vmem>>, vector<32x128xf32>
    %70 = arith.mulf %10, %65 : vector<32x128xf32>
    %71 = arith.addf %66, %70 : vector<32x128xf32>
    %72 = arith.negf %71 : vector<32x128xf32>
    %73 = math.exp %72 : vector<32x128xf32>
    %cst_50 = arith.constant 1.000000e+00 : f32
    %74 = vector.broadcast %cst_50 : f32 to vector<32x128xf32>
    %75 = arith.addf %74, %73 : vector<32x128xf32>
    %76 = arith.divf %74, %75 : vector<32x128xf32>
    %77 = arith.mulf %11, %65 : vector<32x128xf32>
    %78 = arith.addf %67, %77 : vector<32x128xf32>
    %79 = arith.negf %78 : vector<32x128xf32>
    %80 = math.exp %79 : vector<32x128xf32>
    %cst_51 = arith.constant 1.000000e+00 : f32
    %81 = vector.broadcast %cst_51 : f32 to vector<32x128xf32>
    %82 = arith.addf %81, %80 : vector<32x128xf32>
    %83 = arith.divf %81, %82 : vector<32x128xf32>
    %84 = arith.mulf %83, %65 : vector<32x128xf32>
    %85 = math.tanh %68 : vector<32x128xf32>
    %86 = arith.mulf %76, %85 : vector<32x128xf32>
    %87 = arith.addf %84, %86 : vector<32x128xf32>
    %88 = arith.mulf %12, %87 : vector<32x128xf32>
    %89 = arith.addf %69, %88 : vector<32x128xf32>
    %90 = arith.negf %89 : vector<32x128xf32>
    %91 = math.exp %90 : vector<32x128xf32>
    %cst_52 = arith.constant 1.000000e+00 : f32
    %92 = vector.broadcast %cst_52 : f32 to vector<32x128xf32>
    %93 = arith.addf %92, %91 : vector<32x128xf32>
    %94 = arith.divf %92, %93 : vector<32x128xf32>
    %95 = math.tanh %87 : vector<32x128xf32>
    %96 = arith.mulf %94, %95 : vector<32x128xf32>
    %c32_53 = arith.constant 32 : index
    %c0_54 = arith.constant 0 : index
    %97 = vector.load %arg11[%c32_53, %c0_54] : memref<64x128xf32, #tpu.memory_space<vmem>>, vector<32x128xf32>
    tpu.vector_store %arg11[%c32_53, %c0_54], %96 {strides = array<i32>} : memref<64x128xf32, #tpu.memory_space<vmem>>, vector<32x128xf32>,
    %c32_55 = arith.constant 32 : index
    %c0_56 = arith.constant 0 : index
    %98 = vector.load %arg12[%c32_55, %c0_56] : memref<64x128xf32, #tpu.memory_space<vmem>>, vector<32x128xf32>
    tpu.vector_store %arg12[%c32_55, %c0_56], %87 {strides = array<i32>} : memref<64x128xf32, #tpu.memory_space<vmem>>, vector<32x128xf32>,
    return
  }
  func.func @transform_0(%arg0: i32) -> (i32, i32) {
    %c0_i32 = arith.constant 0 : i32
    %c0_i32_0 = arith.constant 0 : i32
    return %arg0, %c0_i32 : i32, i32
  }
  func.func @transform_1(%arg0: i32) -> (i32, i32) {
    %c0_i32 = arith.constant 0 : i32
    %c0_i32_0 = arith.constant 0 : i32
    return %arg0, %c0_i32 : i32, i32
  }
  func.func @transform_2(%arg0: i32) -> (i32, i32) {
    %c0_i32 = arith.constant 0 : i32
    %c0_i32_0 = arith.constant 0 : i32
    return %arg0, %c0_i32 : i32, i32
  }
  func.func @transform_3(%arg0: i32) -> (i32, i32) {
    %c0_i32 = arith.constant 0 : i32
    %c0_i32_0 = arith.constant 0 : i32
    %c0_i32_1 = arith.constant 0 : i32
    return %c0_i32, %c0_i32_0 : i32, i32
  }
  func.func @transform_4(%arg0: i32) -> (i32, i32) {
    %c0_i32 = arith.constant 0 : i32
    %c0_i32_0 = arith.constant 0 : i32
    %c0_i32_1 = arith.constant 0 : i32
    return %c0_i32, %c0_i32_0 : i32, i32
  }
  func.func @transform_5(%arg0: i32) -> (i32, i32) {
    %c0_i32 = arith.constant 0 : i32
    %c0_i32_0 = arith.constant 0 : i32
    %c0_i32_1 = arith.constant 0 : i32
    return %c0_i32, %c0_i32_0 : i32, i32
  }
  func.func @transform_6(%arg0: i32) -> (i32, i32) {
    %c0_i32 = arith.constant 0 : i32
    %c0_i32_0 = arith.constant 0 : i32
    %c0_i32_1 = arith.constant 0 : i32
    return %c0_i32, %c0_i32_0 : i32, i32
  }
  func.func @transform_7(%arg0: i32) -> (i32, i32) {
    %c0_i32 = arith.constant 0 : i32
    %c0_i32_0 = arith.constant 0 : i32
    %c0_i32_1 = arith.constant 0 : i32
    return %c0_i32, %c0_i32_0 : i32, i32
  }
  func.func @transform_8(%arg0: i32) -> (i32, i32) {
    %c0_i32 = arith.constant 0 : i32
    %c0_i32_0 = arith.constant 0 : i32
    %c0_i32_1 = arith.constant 0 : i32
    return %c0_i32, %c0_i32_0 : i32, i32
  }
  func.func @transform_9(%arg0: i32) -> (i32, i32) {
    %c0_i32 = arith.constant 0 : i32
    %c0_i32_0 = arith.constant 0 : i32
    %c0_i32_1 = arith.constant 0 : i32
    return %c0_i32, %c0_i32_0 : i32, i32
  }
  func.func @transform_10(%arg0: i32) -> (i32, i32) {
    %c0_i32 = arith.constant 0 : i32
    %c0_i32_0 = arith.constant 0 : i32
    return %arg0, %c0_i32 : i32, i32
  }
  func.func @transform_11(%arg0: i32) -> (i32, i32) {
    %c0_i32 = arith.constant 0 : i32
    %c0_i32_0 = arith.constant 0 : i32
    return %arg0, %c0_i32 : i32, i32
  }
}

</mosaic_0001>

<bundles_post_ra>
// kernel: gcn_lstm_cell.1
= control target key start
LH: loop header
LB: loop body
LE: loop exit
PB: predicated region body
PF: predicated region fallthrough
CT: control target
= control target key end

     0   :  { %v1628_v1 = vmov 0.0   ;;  %vm1629_vm0 = vmmov 0   ;;  %vm324_vm1 = vcmask 261120   ;;  %vm511_vm2 = vcmask 1041408   ;;  %s2166_s3 = inlined_call_operand.vmem [shape: bf16[128,128], index: 3, kind: input, shape index: {}]   ;;  %s2167_s1 = inlined_call_operand.vmem [shape: f32[64,128], index: 1, kind: input, shape index: {}]   ;;  %s2168_s0 = inlined_call_operand.vmem [shape: f32[8,128], index: 0, kind: input, shape index: {}]   ;;  %s2169_s5 = inlined_call_operand.vmem [shape: bf16[128,32], index: 5, kind: input, shape index: {}]   ;;  %s2170_s4 = inlined_call_operand.vmem [shape: bf16[128,4], index: 4, kind: input, shape index: {}]   ;;  %s2171_s2 = inlined_call_operand.vmem [shape: f32[64,128], index: 2, kind: input, shape index: {}]   ;;  %s2172_s7 = inlined_call_operand.vmem [shape: f32[32,128], index: 7, kind: input, shape index: {}]   ;;  %s2173_s6 = inlined_call_operand.vmem [shape: f32[128,128], index: 6, kind: input, shape index: {}]   ;;  %s2174_s8 = inlined_call_operand.vmem [shape: f32[32,128], index: 8, kind: input, shape index: {}]   ;;  %s2175_s9 = inlined_call_operand.vmem [shape: f32[32,128], index: 9, kind: input, shape index: {}]   ;;  %s2176_s11 = inlined_call_operand.vmem [shape: f32[64,128], index: 11, kind: output, shape index: {1}]   ;;  %s2177_s10 = inlined_call_operand.vmem [shape: f32[64,128], index: 10, kind: output, shape index: {0}]  }
   0x1   :  { %v1476_v0 = vld [vmem:[%s2166_s3] sm:$0xff]   ;;  %1320 = vmatprep.subr.bf16.mxu0 %v1628_v1  ;;  %1336 = vmatprep.mubr.msk.bf16.mxu0 %vm1629_vm0, %v1628_v1  ;;  %v1477_v2 = vld [vmem:[%s2166_s3 + $0x8] sm:$0xff]   ;;  %v1478_v3 = vld [vmem:[%s2166_s3 + $0x10] sm:$0xff]   ;;  %vm486_vm3 = vcmask 31744  }
   0x2   :  { %1340 = vmatprep.subr.bf16.mxu1 %v1476_v0  ;;  %1321 = vmatpush3.bf16.msra.mxu0 %v1476_v0  ;;  %v1479_v4 = vld [vmem:[%s2166_s3 + $0x18] sm:$0xff]   ;;  %v144_v5 = vld [vmem:[%s2167_s1] sm:$0xff]  ;;  %v145_v6 = vld [vmem:[%s2167_s1 + $0x8] sm:$0xff] }
   0x3   :  { %1341 = vmatpush3.bf16.msra.mxu1 %v1476_v0  ;;  %1322 = vmatprep.subr.bf16.mxu0 %v1628_v1  ;;  %v152_v7 = vpack.c.bf16 %v145_v6, %v144_v5  ;;  %v1480_v8 = vld [vmem:[%s2166_s3 + $0x20] sm:$0xff]   ;;  %v1481_v9 = vld [vmem:[%s2166_s3 + $0x28] sm:$0xff]   ;;  %v1482_v10 = vld [vmem:[%s2166_s3 + $0x30] sm:$0xff]  }
   0x4   :  { %1342 = vmatprep.subr.bf16.mxu1 %v1477_v2  ;;  %v1483_v11 = vld [vmem:[%s2166_s3 + $0x38] sm:$0xff]   ;;  %v54_v12 = vld [vmem:[%s2168_s0] sm:$0xff]  ;;  %v146_v13 = vld [vmem:[%s2167_s1 + $0x10] sm:$0xff] }
   0x5   :  { %1356 = vmatprep.mubr.bf16.mxu1 %v152_v7  ;;  %v147_v14 = vld [vmem:[%s2167_s1 + $0x18] sm:$0xff]  ;;  %v148_v15 = vld [vmem:[%s2167_s1 + $0x20] sm:$0xff]  ;;  %v149_v16 = vld [vmem:[%s2167_s1 + $0x28] sm:$0xff]  ;;  %v55_v17 = vpack.c.bf16 %v54_v12, %v54_v12 }
   0x6   :  { %1323 = vmatpush3.bf16.msra.mxu0 %v1477_v2  ;;  %v153_v18 = vpack.c.bf16 %v147_v14, %v146_v13  ;;  %v154_v19 = vpack.c.bf16 %v149_v16, %v148_v15  ;;  %v150_v20 = vld [vmem:[%s2167_s1 + $0x30] sm:$0xff]  ;;  %v151_v21 = vld [vmem:[%s2167_s1 + $0x38] sm:$0xff]  ;;  %v1484_v23 = vld [vmem:[%s2169_s5] sm:$0xff]  }
   0x7   :  { %1343 = vmatpush3.bf16.msra.mxu1 %v1477_v2  ;;  %1324 = vmatprep.subr.bf16.mxu0 %v1628_v1  ;;  %v155_v22 = vpack.c.bf16 %v151_v21, %v150_v20  ;;  %v1485_v38 = vld [vmem:[%s2169_s5 + $0x8] sm:$0xff]   ;;  %v1486_v41 = vld [vmem:[%s2169_s5 + $0x10] sm:$0xff]   ;;  %v1487_v45 = vld [vmem:[%s2169_s5 + $0x18] sm:$0xff]  }
   0x8   :  { %1344 = vmatprep.subr.bf16.mxu1 %v1478_v3  ;;  %v1488_v46 = vld [vmem:[%s2169_s5 + $0x20] sm:$0xff]   ;;  %v1489_v48 = vld [vmem:[%s2169_s5 + $0x28] sm:$0xff]   ;;  %v1490_v49 = vld [vmem:[%s2169_s5 + $0x30] sm:$0xff]  }
   0x9   :  { %v1491_v50 = vld [vmem:[%s2169_s5 + $0x38] sm:$0xff]   ;;  %v1492_v51 = vld [vmem:[%s2170_s4] sm:$0xff]   ;;  %v1493_v52 = vld [vmem:[%s2170_s4 + $0x8] sm:$0xff]  }
   0xa   :  { %1325 = vmatpush3.bf16.msra.mxu0 %v1478_v3  ;;  %v1494_v53 = vld [vmem:[%s2170_s4 + $0x10] sm:$0xff]   ;;  %v1495_v54 = vld [vmem:[%s2170_s4 + $0x18] sm:$0xff]   ;;  %v1496_v55 = vld [vmem:[%s2170_s4 + $0x20] sm:$0xff]  }
   0xb   :  { %1345 = vmatpush3.bf16.msra.mxu1 %v1478_v3  ;;  %1326 = vmatprep.subr.bf16.mxu0 %v1628_v1  ;;  %v1497_v56 = vld [vmem:[%s2170_s4 + $0x28] sm:$0xff]   ;;  %v1498_v57 = vld [vmem:[%s2170_s4 + $0x30] sm:$0xff]   ;;  %v1499_v58 = vld [vmem:[%s2170_s4 + $0x38] sm:$0xff]  }
   0xc   :  { %1346 = vmatprep.subr.bf16.mxu1 %v1479_v4  ;;  %v271_v59 = vld [vmem:[%s2172_s7 + $0x10] sm:$0xff]  ;;  %v269_v61 = vld [vmem:[%s2172_s7] sm:$0xff]  ;;  %v1847_v0 = vld [vmem:[%s2172_s7 + $0x18] sm:$0xff] }
   0xd   :  { %v1831_v60 = vld [vmem:[%s2171_s2 + $0x10] sm:$0xff]  ;;  %v1839_v62 = vld [vmem:[%s2171_s2] sm:$0xff]  ;;  %v1866_v5 = vld [vmem:[%s2171_s2 + $0x8] sm:$0xff] }
   0xe   :  { %1327 = vmatpush3.bf16.msra.mxu0 %v1479_v4  ;;  %v255_v63 = vld [vmem:[%s2173_s6 + $0x10] sm:$0xff]  ;;  %v666_v2 = vmul.f32 %v1831_v60, %v271_v59  ;;  %v253_v3 = vld [vmem:[%s2173_s6] sm:$0xff]  ;;  %v664_v7 = vmul.f32 %v1839_v62, %v269_v61  ;;  %v1877_v12 = vld [vmem:[%s2173_s6 + $0x8] sm:$0xff] }
   0xf   :  { %1347 = vmatpush3.bf16.msra.mxu1 %v1479_v4  ;;  %1328 = vmatprep.subr.bf16.mxu0 %v1628_v1  ;;  %v1861_v4 = vld [vmem:[%s2172_s7 + $0x8] sm:$0xff]  ;;  %v1885_v21 = vld [vmem:[%s2174_s8 + $0x10] sm:$0xff] }
  0x10   :  { %1348 = vmatprep.subr.bf16.mxu1 %v1480_v8  ;;  %v665_v15 = vmul.f32 %v1866_v5, %v1861_v4 }
  0x12   :  { %1329 = vmatpush3.bf16.msra.mxu0 %v1480_v8 }
  0x13   :  { %1349 = vmatpush3.bf16.msra.mxu1 %v1480_v8  ;;  %1330 = vmatprep.subr.bf16.mxu0 %v1628_v1  ;;  %v256_v8 = vld [vmem:[%s2173_s6 + $0x18] sm:$0xff] }
  0x14   :  { %1350 = vmatprep.subr.bf16.mxu1 %v1481_v9 }
  0x16   :  { %1331 = vmatpush3.bf16.msra.mxu0 %v1481_v9 }
  0x17   :  { %1351 = vmatpush3.bf16.msra.mxu1 %v1481_v9  ;;  %1332 = vmatprep.subr.bf16.mxu0 %v1628_v1 }
  0x18   :  { %1352 = vmatprep.subr.bf16.mxu1 %v1482_v10 }
  0x1a   :  { %1333 = vmatpush3.bf16.msra.mxu0 %v1482_v10 }
  0x1b   :  { %1353 = vmatpush3.bf16.msra.mxu1 %v1482_v10  ;;  %1334 = vmatprep.subr.bf16.mxu0 %v1628_v1  ;;  %v1852_v1 = vld [vmem:[%s2171_s2 + $0x18] sm:$0xff] }
  0x1c   :  { %1354 = vmatprep.subr.bf16.mxu1 %v1483_v11 }
  0x1e   :  { %1335 = vmatpush3.bf16.msra.mxu0 %v1483_v11 }
  0x1f   :  { %1355 = vmatpush3.bf16.msra.mxu1 %v1483_v11  ;;  %v667_v11 = vmul.f32 %v1852_v1, %v1847_v0 }
  0x21   :  { %1337 = vmatmul.mubr.bf16.vlgmr.msra.gmra.mrb[0].mxu0 %v55_v17 }
  0x22   :  { %1357 = vmatmul.mubr.bf16.vlgmr.msra.gmra.mrb[0].mxu1 %v153_v18  ;;  %1368 = vmatprep.mubr.msk.bf16.mxu0 %vm324_vm1, %v1484_v23 }
  0x23   :  { %1360 = vmatprep.mubr.bf16.mxu1 %v154_v19 }
  0x2a   :  { %1361 = vmatmul.mubr.bf16.gmra.mrb[4].mxu1 %v155_v22  ;;  %v1890_v22 = vld [vmem:[%s2171_s2 + $0x30] sm:$0xff] }
  0x2b   :  { %1406 = vmatprep.mubr.msk.bf16.mxu1 %vm324_vm1, %v1484_v23 }
  0xf4   :  { %v138_v24 = vpop.f32.mrb[0].mxu0 }
  0xf5   :  { %v1358_v25 = vpop.f32.mrb[0].mxu1  ;;  %v1338_v26 = vpop.f32.mrb[1].mxu0  ;;  %v281_v35 = vpack.c.bf16 %v138_v24, %v138_v24 }
  0xf6   :  { %v190_v27 = vpop.f32.mrb[1].mxu1  ;;  %v141_v28 = vpop.f32.mrb[2].mxu0  ;;  %v1900_v26 = vld [vmem:[%s2171_s2 + $0x20] sm:$0xff] }
  0xf7   :  { %v1359_v29 = vpop.f32.mrb[2].mxu1  ;;  %v1339_v30 = vpop.f32.mrb[3].mxu0  ;;  %v513_v43 = vsel %vm511_vm2, %v281_v35, 0  ;;  %v892_v44 = vrot.slane %v281_v35, 2 }
  0xf8   :  { %v283_v31 = vpack.c.bf16 %v1359_v29, %v1358_v25  ;;  %v193_v32 = vpop.f32.mrb[3].mxu1  ;;  %v1895_v25 = vld [vmem:[%s2174_s8] sm:$0xff]  ;;  %v1905_v29 = vld [vmem:[%s2173_s6 + $0x30] sm:$0xff]  ;;  %v1910_v30 = vld [vmem:[%s2174_s8 + $0x18] sm:$0xff] }
  0xf9   :  { %v282_v33 = vpack.c.bf16 %v193_v32, %v190_v27  ;;  %v894_v47 = vsel %vm511_vm2, %v892_v44, 0  ;;  %v698_v32 = vmul.f32 %v1831_v60, %v1885_v21 }
  0xfb   :  { %1364 = vmatprep.subr.bf16.mxu0 %v282_v33 }
  0xfc   :  { %1365 = vmatpush3.bf16.msra.mxu0 %v282_v33  ;;  %v1047_v33 = vmul.f32 %v1890_v22, %v271_v59 }
  0xfd   :  { %v1362_v34 = vpop.f32.mrb[4].mxu1  ;;  %1366 = vmatprep.subr.bf16.mxu0 %v283_v31 }
  0xfe   :  { %v206_v36 = vpop.f32.mrb[5].mxu1 }
  0xff   :  { %v1363_v37 = vpop.f32.mrb[6].mxu1 }
 0x100   :  { %v793_v39 = vpack.c.bf16 %v1363_v37, %v1362_v34  ;;  %v209_v40 = vpop.f32.mrb[7].mxu1  ;;  %1367 = vmatpush3.bf16.msra.mxu0 %v283_v31  ;;  %v1918_v34 = vld [vmem:[%s2173_s6 + $0x20] sm:$0xff] }
 0x101   :  { %v792_v42 = vpack.c.bf16 %v209_v40, %v206_v36  ;;  %1472 = vmatprep.subr.msk.bf16.mxu0 %vm511_vm2, %v281_v35  ;;  %v1926_v40 = vld [vmem:[%s2173_s6 + $0x38] sm:$0xff] }
 0x103   :  { %1369 = vmatmul.mubr.msk.bf16.vlgmr.msra.gmra.mrb[4].mxu0 %vm324_vm1, %v1485_v38  ;;  %1402 = vmatprep.subr.bf16.mxu1 %v792_v42 }
 0x104   :  { %1403 = vmatpush3.bf16.msra.mxu1 %v792_v42  ;;  %1372 = vmatprep.mubr.msk.bf16.mxu0 %vm324_vm1, %v1486_v41 }
 0x105   :  { %1404 = vmatprep.subr.bf16.mxu1 %v793_v39  ;;  %1385 = vmatpush3.bf16.msra.mxu0 %v513_v43 }
 0x108   :  { %1405 = vmatpush3.bf16.msra.mxu1 %v793_v39  ;;  %v1045_v39 = vmul.f32 %v1900_v26, %v269_v61 }
 0x109   :  { %1473 = vmatprep.subr.msk.bf16.mxu1 %vm511_vm2, %v892_v44 }
 0x10b   :  { %1373 = vmatmul.mubr.msk.bf16.gmra.mrb[8].mxu0 %vm324_vm1, %v1487_v45  ;;  %1407 = vmatmul.mubr.msk.bf16.vlgmr.msra.gmra.mrb[8].mxu1 %vm324_vm1, %v1485_v38  ;;  %v696_v38 = vmul.f32 %v1839_v62, %v1895_v25 }
 0x10c   :  { %1376 = vmatprep.mubr.msk.bf16.mxu0 %vm324_vm1, %v1488_v46  ;;  %1410 = vmatprep.mubr.msk.bf16.mxu1 %vm324_vm1, %v1486_v41 }
 0x10d   :  { %1423 = vmatpush3.bf16.msra.mxu1 %v894_v47 }
 0x113   :  { %1377 = vmatmul.mubr.msk.bf16.gmra.mrb[12].mxu0 %vm324_vm1, %v1489_v48  ;;  %1411 = vmatmul.mubr.msk.bf16.gmra.mrb[12].mxu1 %vm324_vm1, %v1487_v45  ;;  %v699_v45 = vmul.f32 %v1852_v1, %v1910_v30 }
 0x114   :  { %1380 = vmatprep.mubr.msk.bf16.mxu0 %vm324_vm1, %v1490_v49  ;;  %1414 = vmatprep.mubr.msk.bf16.mxu1 %vm324_vm1, %v1488_v46  ;;  %v1934_v46 = vld [vmem:[%s2174_s8 + $0x8] sm:$0xff] }
 0x115   :  { %v697_v59 = vmul.f32 %v1866_v5, %v1934_v46 }
 0x11b   :  { %1381 = vmatmul.mubr.msk.bf16.gmra.mrb[16].mxu0 %vm324_vm1, %v1491_v50  ;;  %1415 = vmatmul.mubr.msk.bf16.gmra.mrb[16].mxu1 %vm324_vm1, %v1489_v48 }
 0x11c   :  { %1386 = vmatprep.mubr.msk.bf16.mxu0 %vm486_vm3, %v1492_v51  ;;  %1418 = vmatprep.mubr.msk.bf16.mxu1 %vm324_vm1, %v1490_v49 }
 0x123   :  { %1387 = vmatmul.mubr.msk.bf16.vlgmr.msra.gmra.mrb[4].mxu0 %vm486_vm3, %v1493_v52  ;;  %1419 = vmatmul.mubr.msk.bf16.gmra.mrb[20].mxu1 %vm324_vm1, %v1491_v50 }
 0x124   :  { %1390 = vmatprep.mubr.msk.bf16.mxu0 %vm486_vm3, %v1494_v53  ;;  %1424 = vmatprep.mubr.msk.bf16.mxu1 %vm486_vm3, %v1492_v51  ;;  %v1940_v51 = vld [vmem:[%s2173_s6 + $0x28] sm:$0xff] }
 0x12b   :  { %1391 = vmatmul.mubr.msk.bf16.gmra.mrb[8].mxu0 %vm486_vm3, %v1495_v54  ;;  %1425 = vmatmul.mubr.msk.bf16.vlgmr.msra.gmra.mrb[8].mxu1 %vm486_vm3, %v1493_v52 }
 0x12c   :  { %1394 = vmatprep.mubr.msk.bf16.mxu0 %vm486_vm3, %v1496_v55  ;;  %1428 = vmatprep.mubr.msk.bf16.mxu1 %vm486_vm3, %v1494_v53 }
 0x133   :  { %1395 = vmatmul.mubr.msk.bf16.gmra.mrb[12].mxu0 %vm486_vm3, %v1497_v56  ;;  %1429 = vmatmul.mubr.msk.bf16.gmra.mrb[12].mxu1 %vm486_vm3, %v1495_v54  ;;  %v1946_v54 = vld [vmem:[%s2171_s2 + $0x38] sm:$0xff] }
 0x134   :  { %1398 = vmatprep.mubr.msk.bf16.mxu0 %vm486_vm3, %v1498_v57  ;;  %1432 = vmatprep.mubr.msk.bf16.mxu1 %vm486_vm3, %v1496_v55 }
 0x13b   :  { %1399 = vmatmul.mubr.msk.bf16.gmra.mrb[16].mxu0 %vm486_vm3, %v1499_v58  ;;  %1433 = vmatmul.mubr.msk.bf16.gmra.mrb[16].mxu1 %vm486_vm3, %v1497_v56 }
 0x13c   :  { %1436 = vmatprep.mubr.msk.bf16.mxu1 %vm486_vm3, %v1498_v57 }
 0x143   :  { %1437 = vmatmul.mubr.msk.bf16.gmra.mrb[20].mxu1 %vm486_vm3, %v1499_v58 }
 0x1f6   :  { %v1388_v6 = vpop.f32.mrb[4].mxu0 }
 0x1f7   :  { %v614_v9 = vadd.f32 %v1388_v6, %v255_v63  ;;  %v549_v10 = vpop.f32.mrb[5].mxu0 }
 0x1f8   :  { %v612_v13 = vadd.f32 %v549_v10, %v253_v3  ;;  %v1389_v14 = vpop.f32.mrb[6].mxu0 }
 0x1f9   :  { %v670_v16 = vadd.f32 %v666_v2, %v614_v9  ;;  %v615_v17 = vadd.f32 %v1389_v14, %v256_v8  ;;  %v552_v18 = vpop.f32.mrb[7].mxu0  ;;  %v1048_v9 = vmul.f32 %v1946_v54, %v1847_v0 }
 0x1fa   :  { %v668_v19 = vadd.f32 %v664_v7, %v612_v13  ;;  %v613_v20 = vadd.f32 %v552_v18, %v1877_v12  ;;  %v1956_v13 = vld [vmem:[%s2171_s2 + $0x28] sm:$0xff] }
 0x1fb   :  { %v1223_v23 = vmul.f32 -1.442695, %v670_v16  ;;  %v671_v24 = vadd.f32 %v667_v11, %v615_v17 }
 0x1fc   :  { %v1221_v27 = vmul.f32 -1.442695, %v668_v19  ;;  %v669_v28 = vadd.f32 %v665_v15, %v613_v20 }
 0x1fd   :  { %1500 = vpow2.f32 %v1223_v23  ;;  %v1224_v31 = vmul.f32 -1.442695, %v671_v24 }
 0x1fe   :  { %1502 = vpow2.f32 %v1221_v27  ;;  %v1222_v35 = vmul.f32 -1.442695, %v669_v28  ;;  %v1392_v36 = vpop.f32.mrb[8].mxu0  ;;  %v1426_v37 = vpop.f32.mrb[8].mxu1 }
 0x1ff   :  { %1504 = vpow2.f32 %v1224_v31  ;;  %v618_v41 = vadd.f32 %v1392_v36, %v1905_v29  ;;  %v995_v42 = vadd.f32 %v1426_v37, %v255_v63  ;;  %v565_v43 = vpop.f32.mrb[9].mxu0  ;;  %v930_v44 = vpop.f32.mrb[9].mxu1 }
 0x200   :  { %v616_v47 = vadd.f32 %v565_v43, %v1918_v34  ;;  %v993_v48 = vadd.f32 %v930_v44, %v253_v3  ;;  %v1393_v49 = vpop.f32.mrb[10].mxu0  ;;  %v1427_v50 = vpop.f32.mrb[10].mxu1  ;;  %1506 = vpow2.f32 %v1222_v35  ;;  %v1077_v43 = vmul.f32 %v1900_v26, %v1895_v25 }
 0x201   :  { %v702_v52 = vadd.f32 %v698_v32, %v618_v41  ;;  %v619_v53 = vadd.f32 %v1393_v49, %v1926_v40  ;;  %v568_v55 = vpop.f32.mrb[11].mxu0  ;;  %v933_v56 = vpop.f32.mrb[11].mxu1  ;;  %v1051_v57 = vadd.f32 %v1047_v33, %v995_v42  ;;  %v996_v7 = vadd.f32 %v1427_v50, %v256_v8 }
 0x202   :  { %v700_v58 = vadd.f32 %v696_v38, %v616_v47  ;;  %v1049_v63 = vadd.f32 %v1045_v39, %v993_v48  ;;  %v617_v3 = vadd.f32 %v568_v55, %v1940_v51  ;;  %v994_v32 = vadd.f32 %v933_v56, %v1877_v12  ;;  %v1968_v38 = vld [vmem:[%s2173_s6 + $0x50] sm:$0xff] }
 0x203   :  { %v1227_v61 = vmul.f32 -1.442695, %v702_v52  ;;  %v703_v2 = vadd.f32 %v699_v45, %v619_v53  ;;  %v1251_v11 = vmul.f32 -1.442695, %v1051_v57  ;;  %v1052_v24 = vadd.f32 %v1048_v9, %v996_v7 }
 0x204   :  { %v1225_v6 = vmul.f32 -1.442695, %v700_v58  ;;  %v1249_v17 = vmul.f32 -1.442695, %v1049_v63  ;;  %v701_v18 = vadd.f32 %v697_v59, %v617_v3  ;;  %v1046_v33 = vmul.f32 %v1956_v13, %v1861_v4  ;;  %v1992_v58 = vld [vmem:[%s2173_s6 + $0x40] sm:$0xff] }
 0x205   :  { %1508 = vpow2.f32 %v1227_v61  ;;  %v1228_v10 = vmul.f32 -1.442695, %v703_v2  ;;  %v1079_v12 = vmul.f32 %v1890_v22, %v1885_v21  ;;  %v1252_v4 = vmul.f32 -1.442695, %v1052_v24 }
 0x206   :  { %v1396_v14 = vpop.f32.mrb[12].mxu0  ;;  %v1430_v15 = vpop.f32.mrb[12].mxu1  ;;  %1510 = vpow2.f32 %v1225_v6  ;;  %v1226_v39 = vmul.f32 -1.442695, %v701_v18  ;;  %v1050_v44 = vadd.f32 %v1046_v33, %v994_v32  ;;  %v1080_v6 = vmul.f32 %v1946_v54, %v1910_v30 }
 0x207   :  { %v1501_v16 = vpop.eup %1500  ;;  %v581_v19 = vpop.f32.mrb[13].mxu0  ;;  %1512 = vpow2.f32 %v1228_v10  ;;  %v999_v41 = vadd.f32 %v1430_v15, %v1905_v29  ;;  %v622_v45 = vadd.f32 %v1396_v14, %v1968_v38  ;;  %v264_v10 = vld [vmem:[%s2173_s6 + $0x58] sm:$0xff] }
 0x208   :  { %v946_v20 = vpop.f32.mrb[13].mxu1  ;;  %v1503_v8 = vpop.eup %1502  ;;  %v686_v23 = vadd.f32 1.0, %v1501_v16  ;;  %1514 = vpow2.f32 %v1251_v11  ;;  %v1250_v57 = vmul.f32 -1.442695, %v1050_v44  ;;  %v1078_v11 = vmul.f32 %v1956_v13, %v1934_v46 }
 0x209   :  { %v1958_v0 = vpop.f32.mrb[14].mxu0  ;;  %v1431_v27 = vpop.f32.mrb[14].mxu1  ;;  %v684_v31 = vadd.f32 1.0, %v1503_v8  ;;  %1516 = vpow2.f32 %v1249_v17  ;;  %v997_v47 = vadd.f32 %v946_v20, %v1918_v34  ;;  %v1083_v21 = vadd.f32 %v1079_v12, %v999_v41 }
 0x20a   :  { %v1505_v28 = vpop.eup %1504  ;;  %v1963_v35 = vpop.f32.mrb[15].mxu0  ;;  %1518 = vrcp.f32 %v686_v23  ;;  %v1000_v3 = vadd.f32 %v1431_v27, %v1926_v40  ;;  %v620_v16 = vadd.f32 %v581_v19, %v1992_v58  ;;  %v623_v20 = vadd.f32 %v1958_v0, %v264_v10 }
 0x20b   :  { %v949_v36 = vpop.f32.mrb[15].mxu1  ;;  %v687_v37 = vadd.f32 1.0, %v1505_v28  ;;  %v1507_v42 = vpop.eup %1506  ;;  %1520 = vrcp.f32 %v684_v31  ;;  %v1081_v59 = vadd.f32 %v1077_v43, %v997_v47  ;;  %v1255_v9 = vmul.f32 -1.442695, %v1083_v21  ;;  %v2029_v47 = vld [vmem:[%s2173_s6 + $0x70] sm:$0xff] }
 0x20c   :  { %v685_v50 = vadd.f32 1.0, %v1507_v42  ;;  %v998_v40 = vadd.f32 %v949_v36, %v1940_v51  ;;  %v1084_v8 = vadd.f32 %v1080_v6, %v1000_v3  ;;  %v2016_v51 = vld [vmem:[%s2173_s6 + $0x48] sm:$0xff] }
 0x20d   :  { %1522 = vrcp.f32 %v687_v37  ;;  %v1253_v30 = vmul.f32 -1.442695, %v1081_v59  ;;  %v621_v12 = vadd.f32 %v1963_v35, %v2016_v51  ;;  %v2035_v35 = vld [vmem:[%s2175_s9 + $0x10] sm:$0xff] }
 0x20e   :  { %v1977_v48 = vpop.f32.mrb[16].mxu0  ;;  %v1979_v49 = vpop.f32.mrb[16].mxu1  ;;  %1524 = vpow2.f32 %v1226_v39  ;;  %v1082_v19 = vadd.f32 %v1078_v11, %v998_v40  ;;  %v1256_v39 = vmul.f32 -1.442695, %v1084_v8 }
 0x20f   :  { %v1509_v29 = vpop.eup %1508  ;;  %v1981_v52 = vpop.f32.mrb[17].mxu0  ;;  %1526 = vpow2.f32 %v1252_v4  ;;  %v1003_v21 = vadd.f32 %v1979_v49, %v1968_v38 }
 0x210   :  { %v1983_v53 = vpop.f32.mrb[17].mxu1  ;;  %v718_v25 = vadd.f32 1.0, %v1509_v29  ;;  %v1985_v55 = vpop.f32.mrb[18].mxu0  ;;  %1528 = vtanh.f32 %v622_v45  ;;  %v1254_v4 = vmul.f32 -1.442695, %v1082_v19 }
 0x211   :  { %v1987_v56 = vpop.f32.mrb[18].mxu1  ;;  %v1511_v34 = vpop.eup %1510 }
 0x212   :  { %v1994_v61 = vpop.f32.mrb[19].mxu0  ;;  %v1996_v63 = vpop.f32.mrb[19].mxu1  ;;  %1530 = vrcp.f32 %v718_v25  ;;  %v716_v2 = vadd.f32 1.0, %v1511_v34  ;;  %v1004_v49 = vadd.f32 %v1987_v56, %v264_v10 }
 0x213   :  { %v1513_v7 = vpop.eup %1512  ;;  %1532 = vrcp.f32 %v685_v50 }
 0x214   :  { %v1515_v14 = vpop.eup %1514  ;;  %1534 = vrcp.f32 %v716_v2  ;;  %v719_v15 = vadd.f32 1.0, %v1513_v7 }
 0x215   :  { %v1517_v17 = vpop.eup %1516  ;;  %1536 = vpow2.f32 %v1250_v57  ;;  %v1067_v27 = vadd.f32 1.0, %v1515_v14  ;;  %v1001_v57 = vadd.f32 %v1983_v53, %v1992_v58 }
 0x216   :  { %v1519_v18 = vpop.eup %1518  ;;  %1538 = vrcp.f32 %v719_v15  ;;  %v2009_v23 = vpop.f32.mrb[20].mxu1  ;;  %v1065_v0 = vadd.f32 1.0, %v1517_v17 }
 0x217   :  { %v1521_v24 = vpop.eup %1520  ;;  %1540 = vpow2.f32 %v1255_v9  ;;  %v2011_v46 = vpop.f32.mrb[21].mxu1 }
 0x218   :  { %v1523_v28 = vpop.eup %1522  ;;  %1542 = vtanh.f32 %v620_v16  ;;  %v2018_v31 = vpop.f32.mrb[22].mxu1  ;;  %v2057_v16 = vld [vmem:[%s2173_s6 + $0x60] sm:$0xff] }
 0x219   :  { %v1525_v32 = vpop.eup %1524  ;;  %1544 = vpow2.f32 %v1253_v30  ;;  %v2020_v33 = vpop.f32.mrb[23].mxu1  ;;  %v2069_v30 = vld [vmem:[%s2173_s6 + $0x78] sm:$0xff] }
 0x21a   :  { %v1527_v36 = vpop.eup %1526  ;;  %v717_v37 = vadd.f32 1.0, %v1525_v32  ;;  %1546 = vtanh.f32 %v623_v20  ;;  %v1002_v20 = vadd.f32 %v1996_v63, %v2016_v51 }
 0x21b   :  { %v1529_v41 = vpop.eup %1528  ;;  %1548 = vrcp.f32 %v1067_v27  ;;  %v1068_v45 = vadd.f32 1.0, %v1527_v36 }
 0x21c   :  { %v1531_v42 = vpop.eup %1530  ;;  %1550 = vrcp.f32 %v717_v37  ;;  %v738_v43 = vmul.f32 %v1529_v41, %v1519_v18  ;;  %v2074_v18 = vld [vmem:[%s2175_s9 + $0x18] sm:$0xff] }
 0x21d   :  { %v2024_v44 = vpop.eup %1532  ;;  %1552 = vrcp.f32 %v1065_v0  ;;  %v730_v29 = vmul.f32 %v1531_v42, %v1831_v60  ;;  %v626_v60 = vadd.f32 %v1977_v48, %v2029_v47 }
 0x21e   :  { %v1535_v50 = vpop.eup %1534  ;;  %1554 = vpow2.f32 %v1256_v39 }
 0x21f   :  { %v1537_v25 = vpop.eup %1536  ;;  %1556 = vtanh.f32 %v621_v12  ;;  %v2039_v34 = vadd.f32 %v738_v43, %v730_v29  ;;  %v728_v38 = vmul.f32 %v1535_v50, %v1839_v62  ;;  %v2062_v62 = vld [vmem:[%s2175_s9] sm:$0xff] }
 0x220   :  { %v1539_v59 = vpop.eup %1538  ;;  %1558 = vpow2.f32 %v1254_v4  ;;  %v1066_v14 = vadd.f32 1.0, %v1537_v25  ;;  %v278_v4 = vld [vmem:[%s2175_s9 + $0x8] sm:$0xff] }
 0x221   :  { %v1541_v2 = vpop.eup %1540  ;;  %1560 = vrcp.f32 %v1068_v45  ;;  %v746_v3 = vmul.f32 %v2039_v34, %v2035_v35  ;;  %790 = vst [vmem:[%s2176_s11 + $0x10] sm:$0xff] %v2039_v34  ;;  %v731_v9 = vmul.f32 %v1539_v59, %v1852_v1 }
 0x222   :  { %v1543_v53 = vpop.eup %1542  ;;  %v1099_v58 = vadd.f32 1.0, %v1541_v2  ;;  %1562 = vtanh.f32 %v1003_v21 }
 0x223   :  { %v1545_v6 = vpop.eup %1544  ;;  %v750_v7 = vadd.f32 %v746_v3, %v626_v60  ;;  %v736_v48 = vmul.f32 %v1543_v53, %v1521_v24  ;;  %1564 = vtanh.f32 %v1001_v57  ;;  %v624_v24 = vadd.f32 %v1981_v52, %v2057_v16 }
 0x224   :  { %v1547_v11 = vpop.eup %1546  ;;  %1566 = vrcp.f32 %v1099_v58  ;;  %v1097_v15 = vadd.f32 1.0, %v1545_v6  ;;  %v627_v52 = vadd.f32 %v1985_v55, %v2069_v30  ;;  %v266_v55 = vld [vmem:[%s2173_s6 + $0x68] sm:$0xff] }
 0x225   :  { %v1549_v56 = vpop.eup %1548  ;;  %v1231_v10 = vmul.f32 -1.442695, %v750_v7  ;;  %v2064_v40 = vadd.f32 %v736_v48, %v728_v38  ;;  %v739_v17 = vmul.f32 %v1547_v11, %v1523_v28  ;;  %1568 = vtanh.f32 %v1004_v49 }
 0x226   :  { %v1551_v1 = vpop.eup %1550  ;;  %1570 = vrcp.f32 %v1097_v15  ;;  %v625_v25 = vadd.f32 %v1994_v61, %v266_v55 }
 0x227   :  { %v1553_v8 = vpop.eup %1552  ;;  %1572 = vpow2.f32 %v1231_v10  ;;  %v744_v27 = vmul.f32 %v2064_v40, %v2062_v62  ;;  %788 = vst [vmem:[%s2176_s11] sm:$0xff] %v2064_v40  ;;  %v2086_v28 = vadd.f32 %v739_v17, %v731_v9  ;;  %v729_v32 = vmul.f32 %v1551_v1, %v1866_v5 }
 0x228   :  { %v1555_v19 = vpop.eup %1554  ;;  %1574 = vrcp.f32 %v1066_v14  ;;  %v1007_v9 = vadd.f32 %v2009_v23, %v2029_v47 }
 0x229   :  { %v1557_v63 = vpop.eup %1556  ;;  %v1100_v51 = vadd.f32 1.0, %v1555_v19  ;;  %v748_v0 = vadd.f32 %v744_v27, %v624_v24  ;;  %v747_v36 = vmul.f32 %v2086_v28, %v2074_v18  ;;  %791 = vst [vmem:[%s2176_s11 + $0x18] sm:$0xff] %v2086_v28  ;;  %1576 = vtanh.f32 %v1002_v20 }
 0x22a   :  { %v1559_v37 = vpop.eup %1558  ;;  %v737_v39 = vmul.f32 %v1557_v63, %v2024_v44  ;;  %v1008_v24 = vadd.f32 %v2018_v31, %v2069_v30  ;;  %v1006_v19 = vadd.f32 %v2020_v33, %v266_v55 }
 0x22b   :  { %v1561_v41 = vpop.eup %1560  ;;  %1578 = vrcp.f32 %v1100_v51  ;;  %v1098_v5 = vadd.f32 1.0, %v1559_v37  ;;  %v1229_v12 = vmul.f32 -1.442695, %v748_v0  ;;  %v751_v42 = vadd.f32 %v747_v36, %v627_v52 }
 0x22c   :  { %v1563_v43 = vpop.eup %1562  ;;  %v2104_v45 = vadd.f32 %v737_v39, %v729_v32 }
 0x22d   :  { %v1565_v29 = vpop.eup %1564  ;;  %1580 = vrcp.f32 %v1098_v5  ;;  %v1232_v44 = vmul.f32 -1.442695, %v751_v42  ;;  %v1119_v50 = vmul.f32 %v1563_v43, %v1549_v56 }
 0x22e   :  { %v1567_v21 = vpop.eup %1566  ;;  %1582 = vpow2.f32 %v1229_v12  ;;  %v745_v57 = vmul.f32 %v2104_v45, %v278_v4  ;;  %789 = vst [vmem:[%s2176_s11 + $0x8] sm:$0xff] %v2104_v45  ;;  %v1117_v59 = vmul.f32 %v1565_v29, %v1553_v8 }
 0x22f   :  { %v1569_v60 = vpop.eup %1568  ;;  %1584 = vpow2.f32 %v1232_v44  ;;  %v1111_v2 = vmul.f32 %v1567_v21, %v1890_v22 }
 0x230   :  { %v1571_v3 = vpop.eup %1570  ;;  %v749_v38 = vadd.f32 %v745_v57, %v625_v25  ;;  %v1120_v49 = vmul.f32 %v1569_v60, %v1561_v41  ;;  %1586 = vtanh.f32 %v2039_v34 }
 0x231   :  { %v1573_v53 = vpop.eup %1572  ;;  %v1123_v58 = vadd.f32 %v1119_v50, %v1111_v2  ;;  %v1109_v6 = vmul.f32 %v1571_v3, %v1900_v26  ;;  %v1005_v26 = vadd.f32 %v2011_v46, %v2057_v16 }
 0x232   :  { %v1575_v61 = vpop.eup %1574  ;;  %v766_v7 = vadd.f32 1.0, %v1573_v53  ;;  %v1230_v48 = vmul.f32 -1.442695, %v749_v38 }
 0x233   :  { %v1127_v11 = vmul.f32 %v1123_v58, %v2035_v35  ;;  %1171 = vst [vmem:[%s2176_s11 + $0x30] sm:$0xff] %v1123_v58  ;;  %v1121_v22 = vadd.f32 %v1117_v59, %v1109_v6  ;;  %v1577_v14 = vpop.eup %1576 }
 0x234   :  { %1588 = vrcp.f32 %v766_v7  ;;  %v1118_v23 = vmul.f32 %v1577_v14, %v1575_v61 }
 0x235   :  { %v1579_v15 = vpop.eup %1578  ;;  %1590 = vpow2.f32 %v1230_v48  ;;  %v1131_v56 = vadd.f32 %v1127_v11, %v1007_v9  ;;  %v1125_v34 = vmul.f32 %v1121_v22, %v2062_v62  ;;  %1169 = vst [vmem:[%s2176_s11 + $0x20] sm:$0xff] %v1121_v22 }
 0x236   :  { %v1112_v47 = vmul.f32 %v1579_v15, %v1946_v54  ;;  %1592 = vtanh.f32 %v2064_v40 }
 0x237   :  { %v1581_v35 = vpop.eup %1580  ;;  %v1259_v10 = vmul.f32 -1.442695, %v1131_v56  ;;  %v1129_v17 = vadd.f32 %v1125_v34, %v1005_v26 }
 0x238   :  { %v1583_v1 = vpop.eup %1582  ;;  %v1124_v20 = vadd.f32 %v1120_v49, %v1112_v47  ;;  %v1110_v46 = vmul.f32 %v1581_v35, %v1956_v13 }
 0x239   :  { %v1585_v16 = vpop.eup %1584  ;;  %v764_v8 = vadd.f32 1.0, %v1583_v1  ;;  %1594 = vpow2.f32 %v1259_v10  ;;  %v1257_v62 = vmul.f32 -1.442695, %v1129_v17 }
 0x23a   :  { %v767_v27 = vadd.f32 1.0, %v1585_v16  ;;  %1596 = vtanh.f32 %v2086_v28  ;;  %v1128_v54 = vmul.f32 %v1124_v20, %v2074_v18  ;;  %1172 = vst [vmem:[%s2176_s11 + $0x38] sm:$0xff] %v1124_v20  ;;  %v1122_v40 = vadd.f32 %v1118_v23, %v1110_v46  ;;  %v1587_v31 = vpop.eup %1586 }
 0x23b   :  { %1598 = vrcp.f32 %v764_v8 }
 0x23c   :  { %1600 = vrcp.f32 %v767_v27  ;;  %v1132_v13 = vadd.f32 %v1128_v54, %v1008_v24  ;;  %v1126_v32 = vmul.f32 %v1122_v40, %v278_v4  ;;  %1170 = vst [vmem:[%s2176_s11 + $0x28] sm:$0xff] %v1122_v40 }
 0x23d   :  { %1602 = vpow2.f32 %v1257_v62 }
 0x23e   :  { %v1589_v30 = vpop.eup %1588  ;;  %v1260_v28 = vmul.f32 -1.442695, %v1132_v13  ;;  %v1130_v18 = vadd.f32 %v1126_v32, %v1006_v19 }
 0x23f   :  { %v1591_v63 = vpop.eup %1590  ;;  %v782_v51 = vmul.f32 %v1589_v30, %v1587_v31 }
 0x240   :  { %v765_v0 = vadd.f32 1.0, %v1591_v63  ;;  %1604 = vpow2.f32 %v1260_v28  ;;  %v1258_v52 = vmul.f32 -1.442695, %v1130_v18  ;;  %v1593_v33 = vpop.eup %1592 }
 0x241   :  { %786 = vst [vmem:[%s2177_s10 + $0x10] sm:$0xff] %v782_v51  ;;  %1606 = vtanh.f32 %v2104_v45 }
 0x242   :  { %1608 = vrcp.f32 %v765_v0 }
 0x243   :  { %v1595_v36 = vpop.eup %1594  ;;  %1610 = vpow2.f32 %v1258_v52 }
 0x244   :  { %v1597_v37 = vpop.eup %1596  ;;  %v1147_v39 = vadd.f32 1.0, %v1595_v36  ;;  %1612 = vtanh.f32 %v1123_v58 }
 0x245   :  { %v1599_v41 = vpop.eup %1598 }
 0x246   :  { %v1601_v5 = vpop.eup %1600  ;;  %v780_v12 = vmul.f32 %v1599_v41, %v1593_v33  ;;  %1614 = vrcp.f32 %v1147_v39 }
 0x247   :  { %v1603_v42 = vpop.eup %1602  ;;  %v783_v55 = vmul.f32 %v1601_v5, %v1597_v37  ;;  %1616 = vtanh.f32 %v1121_v22 }
 0x248   :  { %784 = vst [vmem:[%s2177_s10] sm:$0xff] %v780_v12  ;;  %v1145_v4 = vadd.f32 1.0, %v1603_v42 }
 0x249   :  { %787 = vst [vmem:[%s2177_s10 + $0x18] sm:$0xff] %v783_v55 }
 0x24a   :  { %v1605_v43 = vpop.eup %1604  ;;  %1618 = vrcp.f32 %v1145_v4 }
 0x24b   :  { %v1607_v45 = vpop.eup %1606  ;;  %v1148_v29 = vadd.f32 1.0, %v1605_v43  ;;  %1620 = vtanh.f32 %v1124_v20 }
 0x24c   :  { %v1609_v44 = vpop.eup %1608 }
 0x24d   :  { %v1611_v50 = vpop.eup %1610  ;;  %v781_v21 = vmul.f32 %v1609_v44, %v1607_v45  ;;  %1622 = vrcp.f32 %v1148_v29 }
 0x24e   :  { %v1146_v25 = vadd.f32 1.0, %v1611_v50  ;;  %v1613_v57 = vpop.eup %1612  ;;  %1624 = vtanh.f32 %v1122_v40 }
 0x24f   :  { %785 = vst [vmem:[%s2177_s10 + $0x8] sm:$0xff] %v781_v21 }
 0x250   :  { %v1615_v59 = vpop.eup %1614  ;;  %1626 = vrcp.f32 %v1146_v25 }
 0x251   :  { %v1163_v60 = vmul.f32 %v1615_v59, %v1613_v57  ;;  %v1617_v2 = vpop.eup %1616 }
 0x253   :  { %1167 = vst [vmem:[%s2177_s10 + $0x30] sm:$0xff] %v1163_v60 }
 0x254   :  { %v1619_v3 = vpop.eup %1618 }
 0x255   :  { %v1161_v38 = vmul.f32 %v1619_v3, %v1617_v2  ;;  %v1621_v49 = vpop.eup %1620 }
 0x257   :  { %v1623_v53 = vpop.eup %1622  ;;  %1165 = vst [vmem:[%s2177_s10 + $0x20] sm:$0xff] %v1161_v38 }
 0x258   :  { %v1164_v58 = vmul.f32 %v1623_v53, %v1621_v49  ;;  %v1625_v6 = vpop.eup %1624 }
 0x25a   :  { %v1627_v61 = vpop.eup %1626  ;;  %1168 = vst [vmem:[%s2177_s10 + $0x38] sm:$0xff] %v1164_v58 }
 0x25b   :  { %v1162_v7 = vmul.f32 %v1627_v61, %v1625_v6 }
 0x25d   :  { %1166 = vst [vmem:[%s2177_s10 + $0x28] sm:$0xff] %v1162_v7 }

</bundles_post_ra>
